<compile_context>
chip_gen: v7x
topology: tpu7x:2x2x1
jax: 0.10.0
libtpu: 0.0.40
codegen_flags: <defaults>
</compile_context>

<pallas_src>
import jax
import jax.numpy as jnp
from jax import lax
from jax.experimental import pallas as pl
from jax.experimental.pallas import tpu as pltpu


def _expand_shuffle_norm_kernel(x_ref, w_ref, ws_ref, s_ref, r_ref, rg_ref,
                                b_ref, o_ref):
    # x_ref : (th, W, dim)    compute-dtype tile: th h-rows, all W columns
    # w_ref : (dim, 4*dim)    expand-weight slice for this p1 (image row 4h+p1)
    # ws_ref: (dim, 4)        per-group column sums of w_ref (folded mean weight)
    # s_ref : (4*dim, 4)      0/1 group-sum matrix (variance reduction)
    # r_ref : (4, 4*dim)      0/1 broadcast-back matrix
    # rg_ref: (4, 4*dim)      R * gamma (gamma folded into the broadcast)
    # b_ref : (1, 4*dim)      beta tiled over the 4 p2-groups
    # o_ref : (th, W, 4*dim)  output rows landing at image row 4h + p1
    th, W, dim = x_ref.shape
    inv_dim = 1.0 / dim

    x2 = x_ref[...].reshape(th * W, dim)

    # Expand matmul: bf16 operands, f32 accumulation.
    y = jnp.dot(x2, w_ref[...], preferred_element_type=jnp.float32)          # (tm, 4*dim)

    # Per-group mean through the folded weight: K=dim, N=4 instead of K=4*dim.
    mean_g = jnp.dot(x2, ws_ref[...],
                     preferred_element_type=jnp.float32) * inv_dim           # (tm, 4)
    mean_b = jnp.dot(mean_g, r_ref[...],
                     preferred_element_type=jnp.float32)                     # (tm, 4*dim)

    cen = y - mean_b                                                         # f32
    cen_c = cen.astype(x2.dtype)                                             # compute dtype
    var_g = jnp.dot(cen_c * cen_c, s_ref[...],
                    preferred_element_type=jnp.float32) * inv_dim            # (tm, 4)

    # rsqrt on the tiny per-group stats; gamma already folded into rg_ref.
    scale_g = lax.rsqrt(var_g + 1e-5)                                        # (tm, 4)
    scale_b = jnp.dot(scale_g, rg_ref[...],
                      preferred_element_type=jnp.float32)                    # (tm, 4*dim)

    out = cen * scale_b + b_ref[...]                                         # one FMA
    o_ref[...] = out.reshape(o_ref.shape).astype(o_ref.dtype)


def _largest_divisor_leq(n, cap):
    cap = max(1, min(n, cap))
    for d in range(cap, 0, -1):
        if n % d == 0:
            return d
    return 1


def final_patch_expand_x4(x, w, gamma, beta, *, target_rows=1024,
                          compute_dtype=jnp.bfloat16, out_dtype=None):
    """x: (B, H, W, dim).  w: (dim, 16*dim) == PyTorch expand.weight.T.
    gamma/beta: (dim,).  Returns LayerNorm(pixel_shuffle(x @ w)): (B, 4H, 4W, dim).

    out_dtype=jnp.bfloat16 is recommended when the consumer tolerates it
    (the kernel is HBM-write bound; the output is 16x the input)."""
    B, H, W, dim = x.shape
    p = 4                      # dim_scale
    gd = p * dim               # channels emitted per p1 slice
    out_dtype = x.dtype if out_dtype is None else out_dtype
    # NOTE: for dim < 32 (gd < 128) output stores become masked; still correct.

    # Pad W to a sublane multiple so in-kernel (th,W,c)<->(th*W,c) reshapes are
    # layout-preserving (no hidden per-step VMEM relayout).
    Wp = -(-W // 8) * 8
    if Wp != W:
        x = jnp.pad(x, ((0, 0), (0, 0), (0, Wp - W), (0, 0)))

    BH = B * H
    th_cap = max(1, target_rows // Wp)
    th = _largest_divisor_leq(BH, th_cap)
    # Degenerate factorization (prime-ish B*H): pad rows rather than shrinking
    # grid steps into the ~0.35us/step overhead regime.
    if th < th_cap and th * Wp < 256:
        th = min(th_cap, BH)
    BHp = -(-BH // th) * th
    # Megacore (v7x): keep >= 2 row blocks so sharding lands on the row axis.
    if BHp // th < 2 and th > 1:
        th = _largest_divisor_leq(th, th // 2)   # divides old th => divides BHp
    grid = (BHp // th, p)

    x3 = x.reshape(BH, Wp, dim)
    if BHp != BH:
        x3 = jnp.pad(x3, ((0, BHp - BH), (0, 0), (0, 0)))
    x3 = x3.astype(compute_dtype)

    # (dim, 16*dim) -> (4, dim, 4*dim): p1-major slices; w4[p1] holds the
    # output channels that land on output image row 4*h + p1.
    w4 = w.reshape(dim, p, gd).transpose(1, 0, 2).astype(compute_dtype)
    # Folded mean weight: per-group column sums -> (4, dim, 4).
    ws4 = (w.reshape(dim, p, p, dim).sum(axis=3)
            .transpose(1, 0, 2).astype(compute_dtype))

    grp = jnp.arange(gd, dtype=jnp.int32) // dim
    onehot = grp[:, None] == jnp.arange(p, dtype=jnp.int32)[None, :]
    S = onehot.astype(compute_dtype)                         # (4*dim, 4) group-sum
    R = onehot.T.astype(jnp.float32)                         # (4, 4*dim) broadcast
    g_t = jnp.tile(gamma.astype(jnp.float32), p)
    Rg = R * g_t[None, :]                                    # gamma folded in
    b2 = jnp.tile(beta.astype(jnp.float32), p).reshape(1, gd)

    out4 = pl.pallas_call(
        _expand_shuffle_norm_kernel,
        out_shape=jax.ShapeDtypeStruct((BHp, p, Wp, gd), out_dtype),
        grid_spec=pltpu.PrefetchScalarGridSpec(
            num_scalar_prefetch=0,
            grid=grid,
            in_specs=[
                pl.BlockSpec((th, Wp, dim), lambda i, j: (i, 0, 0)),    # x (reused over p1)
                pl.BlockSpec((None, dim, gd), lambda i, j: (j, 0, 0)),  # w slice for p1
                pl.BlockSpec((None, dim, p), lambda i, j: (j, 0, 0)),   # folded mean weight
                pl.BlockSpec((gd, p), lambda i, j: (0, 0)),             # S
                pl.BlockSpec((p, gd), lambda i, j: (0, 0)),             # R
                pl.BlockSpec((p, gd), lambda i, j: (0, 0)),             # Rg (gamma folded)
                pl.BlockSpec((1, gd), lambda i, j: (0, 0)),             # beta (tiled)
            ],
            out_specs=pl.BlockSpec((th, None, Wp, gd), lambda i, j: (i, j, 0, 0)),
        ),
        compiler_params=pltpu.CompilerParams(
            dimension_semantics=("parallel", "arbitrary")),
    )(x3, w4, ws4, S, R, Rg, b2)

    # (B*H, 4, W, 4*dim) == (B, H, p1, W, p2, dim) -> (B, 4H, 4W, dim):
    # pure C-order regrouping (metadata-only when no padding was added).
    if BHp != BH:
        out4 = out4[:BH]
    out = out4.reshape(B, H * p, Wp * p, dim)
    if Wp != W:
        out = out[:, :, : W * p, :]
    return out


def _reference(x, w, gamma, beta, *, matmul_dtype=jnp.float32):
    B, H, W, dim = x.shape
    y = jnp.einsum("bhwc,cd->bhwd", x.astype(matmul_dtype), w.astype(matmul_dtype),
                   preferred_element_type=jnp.float32)
    y = y.reshape(B, H, W, 4, 4, dim).transpose(0, 1, 3, 2, 4, 5)
    y = y.reshape(B, 4 * H, 4 * W, dim)
    mean = jnp.mean(y, axis=-1, keepdims=True)
    var = jnp.mean(jnp.square(y - mean), axis=-1, keepdims=True)
    return (y - mean) * lax.rsqrt(var + 1e-5) * gamma + beta


if __name__ == "__main__":
    key = jax.random.PRNGKey(0)
    B, H, W, dim = 2, 8, 8, 32

    kx, kw = jax.random.split(key)
    x = jax.random.normal(kx, (B, H, W, dim), dtype=jnp.float32)
    # expand.weight in PyTorch is (16*dim, dim); we store its transpose.
    w = jax.random.normal(kw, (dim, 16 * dim), dtype=jnp.float32) * (dim ** -0.5)
    gamma = jnp.linspace(0.5, 1.5, dim, dtype=jnp.float32)
    beta = jnp.linspace(-0.2, 0.2, dim, dtype=jnp.float32)

    out = final_patch_expand_x4(x, w, gamma, beta)
    out = jax.block_until_ready(out)
    assert out.shape == (B, 4 * H, 4 * W, dim), out.shape

    # Matched-precision reference (same bf16-in / f32-accumulate expand matmul):
    ref_bf = _reference(x, w, gamma, beta, matmul_dtype=jnp.bfloat16)
    # Full f32 reference (module semantics):
    ref_f32 = _reference(x, w, gamma, beta, matmul_dtype=jnp.float32)

    err_bf = float(jnp.max(jnp.abs(out - ref_bf)))
    err_f32 = float(jnp.max(jnp.abs(out - ref_f32)))
    assert jnp.allclose(out, ref_bf, atol=3e-2, rtol=3e-2), err_bf
    assert jnp.allclose(out, ref_f32, atol=8e-2, rtol=8e-2), err_f32
    print("KERNEL_OK")
</pallas_src>

<mosaic_0001>
module attributes {stable_mosaic.version = 11 : i64} {
  func.func @_expand_shuffle_norm_kernel(%arg0: i32, %arg1: i32, %arg2: memref<8x8x32xbf16, #tpu.memory_space<vmem>>, %arg3: memref<1x32x128xbf16, #tpu.memory_space<vmem>>, %arg4: memref<1x32x4xbf16, #tpu.memory_space<vmem>>, %arg5: memref<128x4xbf16, #tpu.memory_space<vmem>>, %arg6: memref<4x128xf32, #tpu.memory_space<vmem>>, %arg7: memref<4x128xf32, #tpu.memory_space<vmem>>, %arg8: memref<1x128xf32, #tpu.memory_space<vmem>>, %arg9: memref<8x1x8x128xf32, #tpu.memory_space<vmem>>) attributes {dimension_semantics = [#tpu.dimension_semantics<parallel>, #tpu.dimension_semantics<arbitrary>], iteration_bounds = array<i64: 2, 4>, scalar_prefetch = 0 : i64, scratch_operands = 0 : i64, tpu.core_type = #tpu.core_type<tc>, window_params = [{transform_indices = @transform_0, window_bounds = array<i64: 8, 8, 32>}, {transform_indices = @transform_1, window_bounds = array<i64: 1, 32, 128>}, {transform_indices = @transform_2, window_bounds = array<i64: 1, 32, 4>}, {pipeline_mode = #tpu.pipeline_mode<synchronous>, transform_indices = @transform_3, window_bounds = array<i64: 128, 4>}, {pipeline_mode = #tpu.pipeline_mode<synchronous>, transform_indices = @transform_4, window_bounds = array<i64: 4, 128>}, {pipeline_mode = #tpu.pipeline_mode<synchronous>, transform_indices = @transform_5, window_bounds = array<i64: 4, 128>}, {pipeline_mode = #tpu.pipeline_mode<synchronous>, transform_indices = @transform_6, window_bounds = array<i64: 1, 128>}, {transform_indices = @transform_7, window_bounds = array<i64: 8, 1, 8, 128>}]} {
    %c0 = arith.constant 0 : index
    %c0_0 = arith.constant 0 : index
    %c0_1 = arith.constant 0 : index
    %0 = vector.load %arg2[%c0, %c0_0, %c0_1] : memref<8x8x32xbf16, #tpu.memory_space<vmem>>, vector<8x8x32xbf16>
    %1 = vector.shape_cast %0 : vector<8x8x32xbf16> to vector<64x32xbf16>
    %c0_2 = arith.constant 0 : index
    %c0_3 = arith.constant 0 : index
    %c0_4 = arith.constant 0 : index
    %2 = vector.load %arg3[%c0_2, %c0_3, %c0_4] : memref<1x32x128xbf16, #tpu.memory_space<vmem>>, vector<1x32x128xbf16>
    %3 = vector.shape_cast %2 : vector<1x32x128xbf16> to vector<32x128xbf16>
    %cst = arith.constant dense<0.000000e+00> : vector<64x128xf32>
    %4 = tpu.matmul %1, %3, %cst {dimension_numbers = #tpu.dot_dimension_numbers<[1], [0], [0], [1], [0, 0, 1, 1], [], []>} : vector<64x32xbf16>, vector<32x128xbf16>, vector<64x128xf32> -> vector<64x128xf32>
    %c0_5 = arith.constant 0 : index
    %c0_6 = arith.constant 0 : index
    %c0_7 = arith.constant 0 : index
    %5 = vector.load %arg4[%c0_5, %c0_6, %c0_7] : memref<1x32x4xbf16, #tpu.memory_space<vmem>>, vector<1x32x4xbf16>
    %6 = vector.shape_cast %5 : vector<1x32x4xbf16> to vector<32x4xbf16>
    %cst_8 = arith.constant dense<0.000000e+00> : vector<64x4xf32>
    %7 = tpu.matmul %1, %6, %cst_8 {dimension_numbers = #tpu.dot_dimension_numbers<[1], [0], [0], [1], [0, 0, 1, 1], [], []>} : vector<64x32xbf16>, vector<32x4xbf16>, vector<64x4xf32> -> vector<64x4xf32>
    %cst_9 = arith.constant 3.125000e-02 : f32
    %8 = vector.broadcast %cst_9 : f32 to vector<64x4xf32>
    %9 = arith.mulf %7, %8 : vector<64x4xf32>
    %c0_10 = arith.constant 0 : index
    %c0_11 = arith.constant 0 : index
    %10 = vector.load %arg6[%c0_10, %c0_11] : memref<4x128xf32, #tpu.memory_space<vmem>>, vector<4x128xf32>
    %cst_12 = arith.constant dense<0.000000e+00> : vector<64x128xf32>
    %11 = tpu.matmul %9, %10, %cst_12 {dimension_numbers = #tpu.dot_dimension_numbers<[1], [0], [0], [1], [0, 0, 1, 1], [], []>} : vector<64x4xf32>, vector<4x128xf32>, vector<64x128xf32> -> vector<64x128xf32>
    %12 = arith.subf %4, %11 : vector<64x128xf32>
    %13 = arith.truncf %12 : vector<64x128xf32> to vector<64x128xbf16>
    %14 = arith.mulf %13, %13 : vector<64x128xbf16>
    %c0_13 = arith.constant 0 : index
    %c0_14 = arith.constant 0 : index
    %15 = vector.load %arg5[%c0_13, %c0_14] : memref<128x4xbf16, #tpu.memory_space<vmem>>, vector<128x4xbf16>
    %cst_15 = arith.constant dense<0.000000e+00> : vector<64x4xf32>
    %16 = tpu.matmul %14, %15, %cst_15 {dimension_numbers = #tpu.dot_dimension_numbers<[1], [0], [0], [1], [0, 0, 1, 1], [], []>} : vector<64x128xbf16>, vector<128x4xbf16>, vector<64x4xf32> -> vector<64x4xf32>
    %cst_16 = arith.constant 3.125000e-02 : f32
    %17 = vector.broadcast %cst_16 : f32 to vector<64x4xf32>
    %18 = arith.mulf %16, %17 : vector<64x4xf32>
    %cst_17 = arith.constant 9.99999974E-6 : f32
    %19 = vector.broadcast %cst_17 : f32 to vector<64x4xf32>
    %20 = arith.addf %18, %19 : vector<64x4xf32>
    %21 = math.rsqrt %20 : vector<64x4xf32>
    %c0_18 = arith.constant 0 : index
    %c0_19 = arith.constant 0 : index
    %22 = vector.load %arg7[%c0_18, %c0_19] : memref<4x128xf32, #tpu.memory_space<vmem>>, vector<4x128xf32>
    %cst_20 = arith.constant dense<0.000000e+00> : vector<64x128xf32>
    %23 = tpu.matmul %21, %22, %cst_20 {dimension_numbers = #tpu.dot_dimension_numbers<[1], [0], [0], [1], [0, 0, 1, 1], [], []>} : vector<64x4xf32>, vector<4x128xf32>, vector<64x128xf32> -> vector<64x128xf32>
    %24 = arith.mulf %12, %23 : vector<64x128xf32>
    %c0_21 = arith.constant 0 : index
    %c0_22 = arith.constant 0 : index
    %25 = vector.load %arg8[%c0_21, %c0_22] : memref<1x128xf32, #tpu.memory_space<vmem>>, vector<1x128xf32>
    %26 = vector.broadcast %25 : vector<1x128xf32> to vector<64x128xf32>
    %27 = arith.addf %24, %26 : vector<64x128xf32>
    %28 = vector.shape_cast %27 : vector<64x128xf32> to vector<8x8x128xf32>
    %c0_23 = arith.constant 0 : index
    %c0_24 = arith.constant 0 : index
    %c0_25 = arith.constant 0 : index
    %c0_26 = arith.constant 0 : index
    %29 = vector.load %arg9[%c0_23, %c0_24, %c0_25, %c0_26] : memref<8x1x8x128xf32, #tpu.memory_space<vmem>>, vector<8x1x8x128xf32>
    %30 = vector.shape_cast %29 : vector<8x1x8x128xf32> to vector<8x8x128xf32>
    %31 = vector.shape_cast %28 : vector<8x8x128xf32> to vector<8x1x8x128xf32>
    tpu.vector_store %arg9[%c0_23, %c0_24, %c0_25, %c0_26], %31 {strides = array<i32>} : memref<8x1x8x128xf32, #tpu.memory_space<vmem>>, vector<8x1x8x128xf32>,
    return
  }
  func.func @transform_0(%arg0: i32, %arg1: i32) -> (i32, i32, i32) {
    %c0_i32 = arith.constant 0 : i32
    %c0_i32_0 = arith.constant 0 : i32
    %c0_i32_1 = arith.constant 0 : i32
    return %arg0, %c0_i32, %c0_i32_0 : i32, i32, i32
  }
  func.func @transform_1(%arg0: i32, %arg1: i32) -> (i32, i32, i32) {
    %c0_i32 = arith.constant 0 : i32
    %c0_i32_0 = arith.constant 0 : i32
    %c0_i32_1 = arith.constant 0 : i32
    return %arg1, %c0_i32, %c0_i32_0 : i32, i32, i32
  }
  func.func @transform_2(%arg0: i32, %arg1: i32) -> (i32, i32, i32) {
    %c0_i32 = arith.constant 0 : i32
    %c0_i32_0 = arith.constant 0 : i32
    %c0_i32_1 = arith.constant 0 : i32
    return %arg1, %c0_i32, %c0_i32_0 : i32, i32, i32
  }
  func.func @transform_3(%arg0: i32, %arg1: i32) -> (i32, i32) {
    %c0_i32 = arith.constant 0 : i32
    %c0_i32_0 = arith.constant 0 : i32
    %c0_i32_1 = arith.constant 0 : i32
    return %c0_i32, %c0_i32_0 : i32, i32
  }
  func.func @transform_4(%arg0: i32, %arg1: i32) -> (i32, i32) {
    %c0_i32 = arith.constant 0 : i32
    %c0_i32_0 = arith.constant 0 : i32
    %c0_i32_1 = arith.constant 0 : i32
    return %c0_i32, %c0_i32_0 : i32, i32
  }
  func.func @transform_5(%arg0: i32, %arg1: i32) -> (i32, i32) {
    %c0_i32 = arith.constant 0 : i32
    %c0_i32_0 = arith.constant 0 : i32
    %c0_i32_1 = arith.constant 0 : i32
    return %c0_i32, %c0_i32_0 : i32, i32
  }
  func.func @transform_6(%arg0: i32, %arg1: i32) -> (i32, i32) {
    %c0_i32 = arith.constant 0 : i32
    %c0_i32_0 = arith.constant 0 : i32
    %c0_i32_1 = arith.constant 0 : i32
    return %c0_i32, %c0_i32_0 : i32, i32
  }
  func.func @transform_7(%arg0: i32, %arg1: i32) -> (i32, i32, i32, i32) {
    %c0_i32 = arith.constant 0 : i32
    %c0_i32_0 = arith.constant 0 : i32
    %c0_i32_1 = arith.constant 0 : i32
    return %arg0, %arg1, %c0_i32, %c0_i32_0 : i32, i32, i32, i32
  }
}

</mosaic_0001>

<bundles_post_ra>
// kernel: tpu_custom_call.1
= control target key start
LH: loop header
LB: loop body
LE: loop exit
PB: predicated region body
PF: predicated region fallthrough
CT: control target
= control target key end

     0   :  { %12 = vsyncpa [#allocation3], 0  ;;  %s1810_s0 = inlined_call_operand.vmem [shape: bf16[16,8,32], index: 0, kind: input, shape index: {}]   ;;  %s1811_s1 = inlined_call_operand.vmem [shape: bf16[4,32,128], index: 1, kind: input, shape index: {}]   ;;  %s1812_s2 = inlined_call_operand.vmem [shape: bf16[4,32,4], index: 2, kind: input, shape index: {}]   ;;  %s1813_s3 = inlined_call_operand.vmem [shape: bf16[128,4], index: 3, kind: input, shape index: {}]   ;;  %s1814_s4 = inlined_call_operand.vmem [shape: f32[4,128], index: 4, kind: input, shape index: {}]   ;;  %s1815_s5 = inlined_call_operand.vmem [shape: f32[4,128], index: 5, kind: input, shape index: {}]   ;;  %s1816_s6 = inlined_call_operand.vmem [shape: f32[1,128], index: 6, kind: input, shape index: {}]   ;;  %s1817_s7 = inlined_call_operand.hbm [shape: f32[16,4,8,128], index: 7, kind: output, shape index: {}]  }
   0x1   :  { %14 = vsyncpa [#allocation3 + $0x1], 0  ;;  %s1557_s24 = smov 0   ;;  %s1559_s25 = smov 0  }
   0x2   :  { %s1561_s26 = smov 0   ;;  %s1563_s27 = smov 0  }
   0x3   :  { %s1565_s28 = smov 0   ;;  %s1567_s29 = smov 0  }
   0x4   :  { %s1569_s30 = smov 0   ;;  %s1571_s8 = smov 0  }
   0x5 LB: > { %1821 = sst [smem:[#allocation5_spill]] %s1507_s30  ;;  %s1129_s9 = sadd.s32 4294967295, %s1511_s8   ;;  %s1511_s8 = sphi %s1571_s8, %s20_s8   ;;  %s1507_s30 = sphi %s1569_s30, %s1828_s30   ;;  %s1503_s29 = sphi %s1567_s29, %s1833_s29   ;;  %s1499_s28 = sphi %s1565_s28, %s1826_s28   ;;  %s1495_s27 = sphi %s1563_s27, %s1832_s27   ;;  %s1491_s26 = sphi %s1561_s26, %s1831_s26   ;;  %s1487_s25 = sphi %s1559_s25, %s1830_s25   ;;  %s1483_s24 = sphi %s1557_s24, %s1829_s24  }
   0x6   : > { %s1130_s10 = sadd.s32 4294967294, %s1511_s8   ;;  %s29_s11 = sadd.s32 1, %s1503_s29 }
   0x7   : > { %p30_p0 = scmp.ge.s32.totalorder %s29_s11, 4  ;;  %s32_s12 = sadd.s32 1, %s1507_s30 }
   0x8   : > { %p213_p1 = scmp.ne.s32.totalorder %s1491_s26, %s1487_s25  ;;  %p214_p2 = scmp.eq.s32.totalorder %s1129_s9, 7 }
   0x9   : > { %s1835_s11 = smov (%p30_p0, %s29_s11), 0  ;;  %s1837_s12 = smov (!%p30_p0, %s32_s12), %s1507_s30 }
   0xa   : > { %1822 = sst [smem:[#allocation6_spill]] %s1835_s11  ;;  %s199_s13 = ssub.s32 %s1503_s29, %s1835_s11 }
   0xb   : > { %p1608_p3 = por %p214_p2, %p213_p1  ;;  %p34_p4 = scmp.ge.s32.totalorder %s1837_s12, 2 }
   0xc   : > { %p219_p5 = scmp.ne.s32.totalorder %s1487_s25, %s1483_s24  ;;  %p220_p6 = scmp.eq.s32.totalorder %s1130_s10, 7 }
   0xd   : > { %p1133_p7 = scmp.ge.s32.totalorder %s1511_s8, 1  ;;  %s1839_s12 = smov (%p34_p4, %s1837_s12), 0 }
   0xe   : > { %1824 = sst [smem:[#allocation7_spill]] %s1839_s12  ;;  %p1617_p8 = por %p220_p6, %p219_p5 }
   0xf   : > { %p275_p9 = scmp.lt.s32.totalorder %s1511_s8, 9  ;;  %s198_s16 = ssub.s32 %s1507_s30, %s1839_s12 }
  0x10   : > { %s203_s17 = sadd.s32 1, %s1491_s26  ;;  %s200_s18 = sor.u32 %s199_s13, %s198_s16 }
  0x11   : > { %p276_p10 = pnand %p1133_p7, %p275_p9  ;;  %p201_p11 = scmp.eq.s32.totalorder %s200_s18, 0 }
  0x12   : > { %p323_p12 = scmp.lt.s32.totalorder (!%p276_p10), %s1495_s27, 3  ;;  %s1135_s20 = sshll.u32 (!%p276_p10), %s1499_s28, 3  ;;  %vm379_vm0 = vcmask (!%p276_p10), 261120   ;;  %v546_v7 = vld [vmem:[%s1814_s4] sm:$0xf] (!%p276_p10)  ;;  %vm572_vm1 = vcmask (!%p276_p10), 1043456  }
  0x13   : > { %s1626_s19 = scalar_select %p201_p11, %s1491_s26, %s203_s17  }
  0x14   : > { %279 = sbr.rel (%p276_p10) target bundleno = 955 (0x3bb), region = 48  ;;  %p318_p13 = scmp.lt.s32.totalorder (!%p276_p10), %s1135_s20, 15  ;;  %v1393_v9 = vld [vmem:[%s1813_s3] sm:$0xff] (!%p276_p10)   ;;  %v1394_v10 = vld [vmem:[%s1813_s3 + $0x8] sm:$0xff] (!%p276_p10)   ;;  %v1395_v11 = vld [vmem:[%s1813_s3 + $0x10] sm:$0xff] (!%p276_p10)   ;;  %vm547_vm2 = vcmask (!%p276_p10), 31744  }
  0x15   : > { %v1396_v12 = vld [vmem:[%s1813_s3 + $0x18] sm:$0xff] (!%p276_p10)   ;;  %v1397_v13 = vld [vmem:[%s1813_s3 + $0x20] sm:$0xff] (!%p276_p10)   ;;  %v1398_v38 = vld [vmem:[%s1813_s3 + $0x28] sm:$0xff] (!%p276_p10)   ;;  %s314_s9 = sand.u32 (!%p276_p10), 1, %s1487_s25   ;;  %s1192_s18 = sshll.u32 (!%p276_p10), %s1499_s28, 5 }
  0x16   : > { %v1399_v39 = vld [vmem:[%s1813_s3 + $0x30] sm:$0xff] (!%p276_p10)   ;;  %v1400_v40 = vld [vmem:[%s1813_s3 + $0x38] sm:$0xff] (!%p276_p10)   ;;  %s1513_s23 = smov (!%p276_p10), [#allocation2]  }
  0x1b   : > { %s324_s21 = scalar_select %p323_p12, %s1495_s27, 3 }
  0x1c   : > { %s1841_s20 = smov (!%p318_p13, %s1135_s20), 15 }
  0x1d   : > { %s1190_s22 = sshll.u32 %s324_s21, 4  ;;  %s1136_s12 = sshll.u32 %s1841_s20, 2 }
  0x1e   : > { %s332_s10 = scalar_lea.vmem %s1812_s2, %s1190_s22  ;;  %s321_s17 = scalar_lea.vmem %s1810_s0, %s1136_s12 }
  0x1f   : > { %v1385_v0 = vld [vmem:[%s332_s10] sm:$0xff]   ;;  %v1386_v1 = vld [vmem:[%s332_s10 + $0x8] sm:$0xff]   ;;  %s327_s30 = scalar_lea.vmem %s1811_s1, %s1190_s22  ;;  %v1389_v4 = vld [vmem:[%s321_s17 + $0x10] sm:$0xff]   ;;  %s1134_s10 = sshll.u32 %s314_s9, 6 }
  0x20   : > { %1247 = vmatprep.subr.bf16.mxu1 %v1385_v0  ;;  %v1387_v2 = vld [vmem:[%s321_s17] sm:$0xff]   ;;  %v1388_v3 = vld [vmem:[%s321_s17 + $0x8] sm:$0xff]   ;;  %v1390_v8 = vld [vmem:[%s321_s17 + $0x18] sm:$0xff]   ;;  %s1730_s17 = scalar_lea.vmem [#allocation2], %s1134_s10  ;;  %s1027_s12 = sadd.s32 %s1495_s27, %s1192_s18 }
  0x21   : > { %1248 = vmatpush3.bf16.msra.mxu1 %v1385_v0  ;;  %1251 = vmatprep.mubr.msk.bf16.mxu1 %vm379_vm0, %v1387_v2  ;;  %v1391_v5 = vld [vmem:[%s327_s30] sm:$0xff]   ;;  %v1392_v6 = vld [vmem:[%s327_s30 + $0x8] sm:$0xff]   ;;  %s1030_s11 = sshll.u32 %s1730_s17, 4  ;;  %s1187_s28 = sshll.u32 %s1027_s12, 7  ;;  %s1745_s11 = int_to_ptr.vmem [resolvable:$true] %s1030_s11 }
  0x22   : > { %1249 = vmatprep.subr.bf16.mxu1 %v1386_v1  ;;  %1239 = vmatprep.mubr.msk.bf16.mxu0 %vm379_vm0, %v1387_v2  ;;  %s1752_s20 = scalar_lea.hbm %s1817_s7, %s1187_s28  ;;  %s1758_s21 = scalar_lea.sflag [#allocation3], %s314_s9 }
  0x23   : > { %1235 = vmatprep.subr.bf16.mxu0 %v1391_v5  ;;  %s1417_s22 = scalar_lea.vmem %s1745_s11, 1024  ;;  %s1421_s10 = sshll.u32 %s1513_s23, 4  ;;  %s1422_s10 = int_to_ptr.vmem [resolvable:$false] %s1421_s10 }
  0x24   : > { %1236 = vmatpush3.bf16.msra.mxu0 %v1391_v5  ;;  %p1418_p0 = scmp.ne.s32.totalorder %s1745_s11, %s1417_s22  ;;  %s1423_s13 = scalar_lea.vmem %s1422_s10, 2048 }
  0x25   : > { %1250 = vmatpush3.bf16.msra.mxu1 %v1386_v1  ;;  %1237 = vmatprep.subr.bf16.mxu0 %v1392_v6  ;;  %v850_v1 = vld [vmem:[%s1815_s5] sm:$0xf]  ;;  %p1424_p4 = scmp.lt.s32.totalorder %s1745_s11, %s1422_s10  ;;  %p1425_p5 = scmp.lt.s32.totalorder %s1423_s13, %s1417_s22 }
  0x26   : > { %1273 = vmatprep.subr.bf16.mxu1 %v1393_v9  ;;  %p1419_p1 = pnand %p1418_p0, %p1608_p3 }
  0x27   : > { %p1426_p6 = por %p1425_p5, %p1424_p4 }
  0x28   : > { %1252 = vmatmul.mubr.msk.bf16.vlgmr.msra.gmra.mrb[0].mxu1 %vm379_vm0, %v1388_v3  ;;  %1238 = vmatpush3.bf16.msra.mxu0 %v1392_v6  ;;  %p1420_p2 = pneg %p1419_p1 }
  0x29   : > { %1255 = vmatprep.mubr.msk.bf16.mxu1 %vm379_vm0, %v1389_v4  ;;  %1259 = vmatprep.subr.msk.mxu0 %vm572_vm1, %v546_v7 }
  0x2a   : > { %1274 = vmatpush3.bf16.msra.mxu1 %v1393_v9  ;;  %p1427_p7 = pnand %p1426_p6, %p1420_p2 }
  0x2b   : > { %1240 = vmatmul.mubr.msk.bf16.vlgmr.msra.gmra.mrb[0].mxu0 %vm379_vm0, %v1388_v3  ;;  %1275 = vmatprep.subr.bf16.mxu1 %v1394_v10 }
  0x2c   : > { %1260 = vmatpush3.msk.msra.mxu0 %vm572_vm1, %v546_v7  ;;  %1243 = vmatprep.mubr.msk.bf16.mxu0 %vm379_vm0, %v1389_v4 }
  0x2d   : > { %1297 = vmatprep.subr.msk.mxu0 %vm572_vm1, %v850_v1 }
  0x2e   : > { %1276 = vmatpush3.bf16.msra.mxu1 %v1394_v10 }
  0x2f   : > { %1277 = vmatprep.subr.bf16.mxu1 %v1395_v11 }
  0x30   : > { %1256 = vmatmul.mubr.msk.bf16.gmra.mrb[4].mxu1 %vm379_vm0, %v1390_v8 }
  0x32   : > { %1278 = vmatpush3.bf16.msra.mxu1 %v1395_v11 }
  0x33   : > { %1244 = vmatmul.mubr.msk.bf16.gmra.mrb[4].mxu0 %vm379_vm0, %v1390_v8  ;;  %1279 = vmatprep.subr.bf16.mxu1 %v1396_v12 }
  0x36   : > { %1280 = vmatpush3.bf16.msra.mxu1 %v1396_v12 }
  0x37   : > { %1281 = vmatprep.subr.bf16.mxu1 %v1397_v13 }
  0x3a   : > { %1282 = vmatpush3.bf16.msra.mxu1 %v1397_v13 }
  0x3b   : > { %1283 = vmatprep.subr.bf16.mxu1 %v1398_v38 }
  0x3e   : > { %1284 = vmatpush3.bf16.msra.mxu1 %v1398_v38 }
  0x3f   : > { %1285 = vmatprep.subr.bf16.mxu1 %v1399_v39 }
  0x42   : > { %1286 = vmatpush3.bf16.msra.mxu1 %v1399_v39 }
  0x43   : > { %1287 = vmatprep.subr.bf16.mxu1 %v1400_v40 }
  0x46   : > { %1288 = vmatpush3.bf16.msra.mxu1 %v1400_v40 }
  0xfb   : > { %v1253_v14 = vpop.f32.mrb[0].mxu1 }
  0xfc   : > { %v507_v15 = vpop.f32.mrb[1].mxu1  ;;  %v540_v20 = vmul.f32 0.03125, %v1253_v14 }
  0xfd   : > { %v538_v16 = vmul.f32 0.03125, %v507_v15  ;;  %v1254_v17 = vpop.f32.mrb[2].mxu1 }
  0xfe   : > { %v510_v18 = vpop.f32.mrb[3].mxu1  ;;  %v1241_v21 = vpop.f32.mrb[0].mxu0  ;;  %v541_v23 = vmul.f32 0.03125, %v1254_v17 }
  0xff   : > { %v539_v19 = vmul.f32 0.03125, %v510_v18  ;;  %1261 = vmatprep.mubr.msk.f32.mxu0 %vm547_vm2, %v538_v16  ;;  %v426_v22 = vpop.f32.mrb[1].mxu0 }
 0x100   : > { %v1242_v25 = vpop.f32.mrb[2].mxu0 }
 0x101   : > { %1262 = vmatmul.mubr.msk.f32.vlgmr.msra.gmra.mrb[8].mxu0 %vm547_vm2, %v539_v19  ;;  %v429_v27 = vpop.f32.mrb[3].mxu0 }
 0x102   : > { %1264 = vmatprep.mubr.msk.f32.mxu0 %vm547_vm2, %v540_v20  ;;  %1298 = vmatpush3.msk.msra.mxu0 %vm572_vm1, %v850_v1 }
 0x103   : > { %v1257_v24 = vpop.f32.mrb[4].mxu1 }
 0x104   : > { %v523_v26 = vpop.f32.mrb[5].mxu1  ;;  %v544_v32 = vmul.f32 0.03125, %v1257_v24 }
 0x105   : > { %v542_v28 = vmul.f32 0.03125, %v523_v26  ;;  %v1258_v29 = vpop.f32.mrb[6].mxu1  ;;  %1265 = vmatmul.mubr.msk.f32.gmra.mrb[10].mxu0 %vm547_vm2, %v541_v23 }
 0x106   : > { %v526_v30 = vpop.f32.mrb[7].mxu1  ;;  %v1245_v33 = vpop.f32.mrb[4].mxu0  ;;  %v545_v35 = vmul.f32 0.03125, %v1258_v29 }
 0x107   : > { %v543_v31 = vmul.f32 0.03125, %v526_v30  ;;  %1267 = vmatprep.mubr.msk.f32.mxu0 %vm547_vm2, %v542_v28  ;;  %v442_v34 = vpop.f32.mrb[5].mxu0 }
 0x108   : > { %v1246_v36 = vpop.f32.mrb[6].mxu0 }
 0x109   : > { %1268 = vmatmul.mubr.msk.f32.gmra.mrb[12].mxu0 %vm547_vm2, %v543_v31  ;;  %v445_v37 = vpop.f32.mrb[7].mxu0 }
 0x10a   : > { %1270 = vmatprep.mubr.msk.f32.mxu0 %vm547_vm2, %v544_v32 }
 0x10d   : > { %1271 = vmatmul.mubr.msk.f32.gmra.mrb[14].mxu0 %vm547_vm2, %v545_v35  ;;  %v1183_v35 = vld [vmem:[%s1816_s6] ss:$0 sm:$0xff] }
 0x1d4   : > { %v1263_v41 = vpop.f32.mrb[8].mxu0 }
 0x1d5   : > { %v1685_v42 = vsub.f32 %v429_v27, %v1263_v41  ;;  %v642_v43 = vpop.f32.mrb[9].mxu0 }
 0x1d6   : > { %v1687_v44 = vsub.f32 %v426_v22, %v642_v43 }
 0x1d8   : > { %v689_v45 = vpack.c.bf16 %v1685_v42, %v1687_v44  ;;  %v1266_v46 = vpop.f32.mrb[10].mxu0 }
 0x1d9   : > { %v1691_v47 = vsub.f32 %v1242_v25, %v1266_v46  ;;  %v652_v48 = vpop.f32.mrb[11].mxu0 }
 0x1da   : > { %v693_v49 = vmul.bf16 %v689_v45, %v689_v45  ;;  %v1693_v50 = vsub.f32 %v1241_v21, %v652_v48 }
 0x1dc   : > { %v690_v51 = vpack.c.bf16 %v1691_v47, %v1693_v50  ;;  %v1269_v52 = vpop.f32.mrb[12].mxu0  ;;  %1289 = vmatprep.mubr.bf16.mxu1 %v693_v49 }
 0x1dd   : > { %v1697_v53 = vsub.f32 %v445_v37, %v1269_v52  ;;  %v662_v54 = vpop.f32.mrb[13].mxu0 }
 0x1de   : > { %v694_v55 = vmul.bf16 %v690_v51, %v690_v51  ;;  %v1699_v56 = vsub.f32 %v442_v34, %v662_v54 }
 0x1e0   : > { %v691_v57 = vpack.c.bf16 %v1697_v53, %v1699_v56  ;;  %v1272_v58 = vpop.f32.mrb[14].mxu0  ;;  %1290 = vmatmul.mubr.bf16.vlgmr.msra.gmra.mrb[8].mxu1 %v694_v55 }
 0x1e1   : > { %v1703_v59 = vsub.f32 %v1246_v36, %v1272_v58  ;;  %v672_v60 = vpop.f32.mrb[15].mxu0 }
 0x1e2   : > { %v695_v61 = vmul.bf16 %v691_v57, %v691_v57  ;;  %v1705_v62 = vsub.f32 %v1245_v33, %v672_v60 }
 0x1e4   : > { %v692_v63 = vpack.c.bf16 %v1703_v59, %v1705_v62  ;;  %1293 = vmatprep.mubr.bf16.mxu1 %v695_v61 }
 0x1e6   : > { %v696_v0 = vmul.bf16 %v692_v63, %v692_v63 }
 0x1e8   : > { %1294 = vmatmul.mubr.bf16.gmra.mrb[12].mxu1 %v696_v0 }
 0x2b3   : > { %v1291_v2 = vpop.f32.mrb[8].mxu1 }
 0x2b4   : > { %v828_v3 = vmul.f32 0.03125, %v1291_v2  ;;  %v795_v4 = vpop.f32.mrb[9].mxu1 }
 0x2b5   : > { %v826_v5 = vmul.f32 0.03125, %v795_v4  ;;  %v1292_v6 = vpop.f32.mrb[10].mxu1 }
 0x2b6   : > { %v798_v7 = vpop.f32.mrb[11].mxu1  ;;  %v829_v9 = vmul.f32 0.03125, %v1292_v6  ;;  %v836_v11 = vadd.f32 1e-05, %v828_v3 }
 0x2b7   : > { %v834_v8 = vadd.f32 1e-05, %v826_v5  ;;  %v827_v10 = vmul.f32 0.03125, %v798_v7 }
 0x2b8   : > { %v837_v13 = vadd.f32 1e-05, %v829_v9 }
 0x2b9   : > { %1401 = vrsqrt.f32 %v834_v8  ;;  %v835_v12 = vadd.f32 1e-05, %v827_v10 }
 0x2bb   : > { %1403 = vrsqrt.f32 %v835_v12  ;;  %v1295_v14 = vpop.f32.mrb[12].mxu1 }
 0x2bc   : > { %1405 = vrsqrt.f32 %v836_v11  ;;  %v832_v15 = vmul.f32 0.03125, %v1295_v14  ;;  %v811_v16 = vpop.f32.mrb[13].mxu1 }
 0x2bd   : > { %v830_v17 = vmul.f32 0.03125, %v811_v16  ;;  %v1296_v18 = vpop.f32.mrb[14].mxu1  ;;  %1407 = vrsqrt.f32 %v837_v13 }
 0x2be   : > { %v814_v19 = vpop.f32.mrb[15].mxu1  ;;  %v833_v21 = vmul.f32 0.03125, %v1296_v18  ;;  %v840_v23 = vadd.f32 1e-05, %v832_v15 }
 0x2bf   : > { %v838_v20 = vadd.f32 1e-05, %v830_v17  ;;  %v831_v22 = vmul.f32 0.03125, %v814_v19 }
 0x2c0   : > { %v841_v26 = vadd.f32 1e-05, %v833_v21 }
 0x2c1   : > { %1409 = vrsqrt.f32 %v838_v20  ;;  %v839_v24 = vadd.f32 1e-05, %v831_v22 }
 0x2c3   : > { %v1402_v25 = vpop.eup %1401  ;;  %1411 = vrsqrt.f32 %v839_v24 }
 0x2c4   : > { %1413 = vrsqrt.f32 %v840_v23  ;;  %1299 = vmatprep.mubr.msk.f32.mxu0 %vm547_vm2, %v1402_v25 }
 0x2c5   : > { %v1404_v27 = vpop.eup %1403  ;;  %1415 = vrsqrt.f32 %v841_v26 }
 0x2c6   : > { %v1406_v28 = vpop.eup %1405  ;;  %1300 = vmatmul.mubr.msk.f32.vlgmr.msra.gmra.mrb[16].mxu0 %vm547_vm2, %v1404_v27 }
 0x2c7   : > { %1302 = vmatprep.mubr.msk.f32.mxu0 %vm547_vm2, %v1406_v28  ;;  %v1408_v29 = vpop.eup %1407 }
 0x2ca   : > { %1303 = vmatmul.mubr.msk.f32.gmra.mrb[18].mxu0 %vm547_vm2, %v1408_v29 }
 0x2cb   : > { %v1410_v30 = vpop.eup %1409 }
 0x2cc   : > { %1305 = vmatprep.mubr.msk.f32.mxu0 %vm547_vm2, %v1410_v30 }
 0x2cd   : > { %v1412_v31 = vpop.eup %1411 }
 0x2ce   : > { %v1414_v32 = vpop.eup %1413  ;;  %1306 = vmatmul.mubr.msk.f32.gmra.mrb[20].mxu0 %vm547_vm2, %v1412_v31 }
 0x2cf   : > { %1308 = vmatprep.mubr.msk.f32.mxu0 %vm547_vm2, %v1414_v32  ;;  %v1416_v33 = vpop.eup %1415 }
 0x2d2   : > { %1309 = vmatmul.mubr.msk.f32.gmra.mrb[22].mxu0 %vm547_vm2, %v1416_v33 }
 0x399   : > { %v1301_v34 = vpop.f32.mrb[16].mxu0 }
 0x39a   : > { %v984_v36 = vmul.f32 %v1301_v34, %v1685_v42  ;;  %v944_v37 = vpop.f32.mrb[17].mxu0 }
 0x39b   : > { %v983_v38 = vmul.f32 %v944_v37, %v1687_v44 }
 0x39c   : > { %v999_v39 = vadd.f32 %v1183_v35, %v984_v36 }
 0x39d   : > { %v998_v40 = vadd.f32 %v1183_v35, %v983_v38  ;;  %v1304_v41 = vpop.f32.mrb[18].mxu0 }
 0x39e   : > { %1007 = vst [vmem:[%s1730_s17 + $0x8] sm:$0xff] %v999_v39  ;;  %v986_v43 = vmul.f32 %v1304_v41, %v1691_v47  ;;  %v954_v45 = vpop.f32.mrb[19].mxu0 }
 0x39f   : > { %1006 = vst [vmem:[%s1730_s17] sm:$0xff] %v998_v40  ;;  %v985_v42 = vmul.f32 %v954_v45, %v1693_v50 }
 0x3a0   : > { %v1001_v44 = vadd.f32 %v1183_v35, %v986_v43 }
 0x3a1   : > { %v1000_v46 = vadd.f32 %v1183_v35, %v985_v42  ;;  %v1307_v48 = vpop.f32.mrb[20].mxu0 }
 0x3a2   : > { %1009 = vst [vmem:[%s1730_s17 + $0x18] sm:$0xff] %v1001_v44  ;;  %v988_v49 = vmul.f32 %v1307_v48, %v1697_v53  ;;  %v964_v51 = vpop.f32.mrb[21].mxu0 }
 0x3a3   : > { %1008 = vst [vmem:[%s1730_s17 + $0x10] sm:$0xff] %v1000_v46  ;;  %v987_v52 = vmul.f32 %v964_v51, %v1699_v56 }
 0x3a4   : > { %v1003_v47 = vadd.f32 %v1183_v35, %v988_v49 }
 0x3a5   : > { %v1002_v50 = vadd.f32 %v1183_v35, %v987_v52  ;;  %v1310_v54 = vpop.f32.mrb[22].mxu0 }
 0x3a6   : > { %1011 = vst [vmem:[%s1730_s17 + $0x28] sm:$0xff] %v1003_v47  ;;  %v990_v55 = vmul.f32 %v1310_v54, %v1703_v59  ;;  %v974_v57 = vpop.f32.mrb[23].mxu0 }
 0x3a7   : > { %1010 = vst [vmem:[%s1730_s17 + $0x20] sm:$0xff] %v1002_v50  ;;  %v989_v53 = vmul.f32 %v974_v57, %v1705_v62 }
 0x3a8   : > { %v1005_v56 = vadd.f32 %v1183_v35, %v990_v55 }
 0x3a9   : > { %v1004_v58 = vadd.f32 %v1183_v35, %v989_v53 }
 0x3aa   : > { %1013 = vst [vmem:[%s1730_s17 + $0x38] sm:$0xff] %v1005_v56 }
 0x3ab   : > { %1012 = vst [vmem:[%s1730_s17 + $0x30] sm:$0xff] %v1004_v58 }
 0x3ac   : > { %1430 = shalt.err (!%p1427_p7)
}
 0x3ad   : > { %s1431_s9 = scalar_lea.hbm %s1752_s20, 1024  ;;  %s1435_s18 = scalar_lea.hbm %s1817_s7, 8192 }
 0x3ae   : > { %p1432_p9 = scmp.ne.s32.totalorder %s1752_s20, %s1431_s9  ;;  %p1436_p12 = scmp.lt.u32.totalorder %s1752_s20, %s1817_s7 }
 0x3af   : > { %p1437_p13 = scmp.lt.u32.totalorder %s1435_s18, %s1431_s9  ;;  %p1439_p1 = scmp.lt.u32.totalorder %s1431_s9, %s1752_s20 }
 0x3b0   : > { %p1433_p10 = pnand %p1432_p9, %p1608_p3 }
 0x3b1   : > { %p1438_p0 = por %p1437_p13, %p1436_p12 }
 0x3b2   : > { %p1434_p11 = pneg %p1433_p10 }
 0x3b3   : > { %p1440_p2 = por %p1439_p1, %p1438_p0 }
 0x3b5   : > { %p1441_p4 = pnand %p1440_p2, %p1434_p11 }
 0x3b7   : > { %1444 = shalt.err (!%p1441_p4)
}
 0x3b8   : > { %s1514_s27 = smov 128   ;;  %s1515_s30 = smov 512  }
 0x3b9   : > { %s1516_s22 = smov 8  }
 0x3ba   : > { %1311 = dma.vmem_to_hbm [thread:$0]  (%p1608_p3), %s1745_s11, 1024, %s1752_s20, %s1758_s21, %s1514_s27, %s1515_s30, %s1516_s22  }
 0x3bb PF: > { %p1317_p5 = scmp.ge.s32.totalorder %s1511_s8, 2  ;;  %s1045_s23 = sand.u32 1, %s1483_s24  }
 0x3bc   : > { %s1046_s10 = scalar_lea.sflag [#allocation3], %s1045_s23 }
 0x3bd   : > { %p1314_p6 = pnand %p1317_p5, %p1617_p8 }
 0x3bf   : > { %1478 = dma.done.wait (!%p1314_p6), %s1046_s10, 1024  }
 0x3c0   : > { %1480 = vsyncadd (!%p1314_p6), %s1046_s10, 4294966272  ;;  %s20_s8 = sadd.s32 1, %s1511_s8   ;;  %s1826_s28 = sld [smem:[#allocation5_spill]] }
 0x3c1   : > { %p17_p7 = scmp.ge.s32.totalorder %s20_s8, 10   ;;  %s1827_s14 = sld [smem:[#allocation6_spill]] }
 0x3c2   : > { %s1828_s30 = sld [smem:[#allocation7_spill]]  ;;  %s1829_s24 = smov %s1487_s25 }
 0x3c3   : > { %s1830_s25 = smov %s1491_s26  ;;  %s1831_s26 = smov %s1626_s19 }
 0x3c4   : > { %s1832_s27 = smov %s1503_s29  ;;  %19 = sbr.rel (!%p17_p7) target bundleno = 5 (0x5), region = 89 }
 0x3c7   : > { %s1833_s29 = smov %s1827_s14 }
 0x3cb   :  { %1051 = vsyncpa [#allocation3], 1 }
 0x3cc   :  { %1053 = vsyncpa [#allocation3 + $0x1], 1 }

</bundles_post_ra>
